<compile_context>
chip_gen: v7x
topology: tpu7x:2x2x1
jax: 0.10.0
libtpu: 0.0.40
codegen_flags: <defaults>
</compile_context>

<pallas_src>
import jax
import jax.numpy as jnp
from jax.experimental import pallas as pl
from jax.experimental.pallas import tpu as pltpu

N_ACTIONS = 2
N_QUANTILES = 51
IN_FEATURES = 4
HIDDEN = 128
OUT_FEATURES = N_ACTIONS * N_QUANTILES  # 102

IN_PAD = 8      # w1 rows padded to one full f32 sublane tile
OUT_PAD = 128   # fc2 / output width padded to one full lane tile (unmasked stores)


def qrdqn_kernel(x_ref, w1_ref, b1_ref, w2_ref, b2_ref, out_ref):
    tb = x_ref.shape[0]
    x = x_ref[...]                                   # (tb, 4)
    w1 = w1_ref[...]                                 # (8, 128); rows 4..7 are zero pad

    # fc1 on the VPU: K=4 is hostile to the MXU -> 4 broadcast FMAs.
    # Bias folded into the accumulator init (no separate broadcast add).
    h = jnp.broadcast_to(b1_ref[...], (tb, HIDDEN))  # (tb, 128)
    for k in range(IN_FEATURES):                     # static, unrolled
        h = h + x[:, k:k + 1] * w1[k:k + 1, :]
    h = jnp.maximum(h, 0.0)                          # ReLU

    # fc2 on the MXU: (tb,128) @ (128,128) -> one lane-dense 128-wide result column.
    # If w2 was prepared as bf16 (v6e/v7x fast path) the cast makes the matmul bf16
    # with f32 accumulation; with f32 weights the cast is a no-op.
    w2 = w2_ref[...]
    y = jnp.dot(h.astype(w2.dtype), w2, preferred_element_type=jnp.float32)
    y = y + b2_ref[...]                              # (1, 128) broadcast; pad cols are 0
    out_ref[...] = y.astype(out_ref.dtype)


def prepare_params(w1, b1, w2, b2, *, fc2_dtype=jnp.float32):
    """One-time parameter prep: pad to TPU-friendly shapes so the hot path never pads.

    w1: (4,128), b1: (1,128) or (128,), w2: (128,102), b2: (1,102) or (102,).
    fc2_dtype=jnp.bfloat16 enables the MXU-native fc2 path on v6e/v7x (keep f32 on v5e
    or when tight numerical tolerances are required).
    """
    w1_p = jnp.zeros((IN_PAD, HIDDEN), jnp.float32).at[:IN_FEATURES, :].set(
        w1.astype(jnp.float32))
    b1_p = jnp.asarray(b1, jnp.float32).reshape(1, HIDDEN)
    w2_p = jnp.zeros((HIDDEN, OUT_PAD), fc2_dtype).at[:, :OUT_FEATURES].set(
        w2.astype(fc2_dtype))
    b2_p = jnp.zeros((1, OUT_PAD), jnp.float32).at[:, :OUT_FEATURES].set(
        jnp.asarray(b2, jnp.float32).reshape(1, OUT_FEATURES))
    return w1_p, b1_p, w2_p, b2_p


def _round_up(v, m):
    return ((v + m - 1) // m) * m


def _choose_tb(b8, max_tb, split_threshold):
    """Pick the batch tile. Large single tile for small/medium B (minimal padding,
    minimal per-step overhead); for big batches split into >= 2 tiles so v7x's two
    TensorCores can each take a shard."""
    if b8 >= split_threshold:
        half = _round_up(pl.cdiv(b8, 2), 8)
        return min(max_tb, half)
    return min(max_tb, b8)


def qrdqn_forward(x, padded_params, *, max_tb=4096, split_threshold=1024):
    """x: (B, 4) f32, padded_params from prepare_params()
    -> (B, n_actions, n_quantiles) f32."""
    w1_p, b1_p, w2_p, b2_p = padded_params
    B = x.shape[0]
    b8 = _round_up(B, 8)                             # sublane-aligned batch
    tb = _choose_tb(b8, max_tb, split_threshold)     # rows per grid step
    b_pad = _round_up(b8, tb)                        # padded batch, multiple of tile
    n_tiles = b_pad // tb

    x_p = x if b_pad == B else jnp.pad(x, ((0, b_pad - B), (0, 0)))

    w2_bytes = jnp.dtype(w2_p.dtype).itemsize * HIDDEN * OUT_PAD
    flops = 2 * b_pad * (IN_FEATURES * HIDDEN + HIDDEN * OUT_PAD)
    bytes_accessed = (4 * (b_pad * IN_FEATURES + b_pad * OUT_PAD
                           + IN_PAD * HIDDEN + HIDDEN + OUT_PAD)
                      + w2_bytes)

    out = pl.pallas_call(
        qrdqn_kernel,
        out_shape=jax.ShapeDtypeStruct((b_pad, OUT_PAD), jnp.float32),
        grid_spec=pltpu.PrefetchScalarGridSpec(
            num_scalar_prefetch=0,
            grid=(n_tiles,),
            in_specs=[
                pl.BlockSpec((tb, IN_FEATURES), lambda i: (i, 0)),   # activations stream
                pl.BlockSpec((IN_PAD, HIDDEN), lambda i: (0, 0)),    # weights resident
                pl.BlockSpec((1, HIDDEN), lambda i: (0, 0)),
                pl.BlockSpec((HIDDEN, OUT_PAD), lambda i: (0, 0)),
                pl.BlockSpec((1, OUT_PAD), lambda i: (0, 0)),
            ],
            out_specs=pl.BlockSpec((tb, OUT_PAD), lambda i: (i, 0)),
        ),
        compiler_params=pltpu.CompilerParams(
            # Batch tiles are independent -> megacore sharding on v7x.
            dimension_semantics=("parallel",),
        ),
        cost_estimate=pl.CostEstimate(
            flops=flops, transcendentals=0, bytes_accessed=bytes_accessed),
    )(x_p, w1_p, b1_p, w2_p, b2_p)

    # Drop batch + lane padding, then .view(-1, n_actions, n_quantiles) equivalent.
    # (Padded rows B..b_pad hold relu(b1)@w2+b2 garbage and MUST stay sliced off.)
    # TODO(synk): for a fused consumer (argmax/quantile-Huber), keep the padded
    # (b_pad, 128) buffer and mask instead of paying this 102-lane relayout slice.
    return out[:B, :OUT_FEATURES].reshape(B, N_ACTIONS, N_QUANTILES)


def init_params(key):
    """Deterministic init mimicking PyTorch nn.Linear default (uniform ±1/sqrt(fan_in)).
    Weights are (in_features, out_features) so the kernel does x @ W."""
    k1, k2, k3, k4 = jax.random.split(key, 4)
    bound1 = 1.0 / jnp.sqrt(IN_FEATURES)
    bound2 = 1.0 / jnp.sqrt(HIDDEN)
    w1 = jax.random.uniform(k1, (IN_FEATURES, HIDDEN), jnp.float32, -bound1, bound1)
    b1 = jax.random.uniform(k2, (1, HIDDEN), jnp.float32, -bound1, bound1)
    w2 = jax.random.uniform(k3, (HIDDEN, OUT_FEATURES), jnp.float32, -bound2, bound2)
    b2 = jax.random.uniform(k4, (1, OUT_FEATURES), jnp.float32, -bound2, bound2)
    return w1, b1, w2, b2


if __name__ == "__main__":
    key = jax.random.PRNGKey(0)
    k_x, k_x2, k_p = jax.random.split(key, 3)

    w1, b1, w2, b2 = init_params(k_p)

    def ref_forward(x):
        r = jnp.maximum(x @ w1 + b1, 0.0) @ w2 + b2
        return r.reshape(x.shape[0], N_ACTIONS, N_QUANTILES)

    # ---- small batch (RL inference shape), f32 fc2, strict check ----
    B = 8  # state dim is 4 (CartPole-style, per Linear(4, 128))
    x = jax.random.normal(k_x, (B, IN_FEATURES), dtype=jnp.float32)
    params_f32 = prepare_params(w1, b1, w2, b2)            # one-time padding
    out = jax.block_until_ready(qrdqn_forward(x, params_f32))
    ref = ref_forward(x)
    assert out.shape == (B, N_ACTIONS, N_QUANTILES), out.shape
    assert jnp.allclose(out, ref, atol=1e-5, rtol=1e-5), "f32 mismatch vs reference"

    # ---- batch above split_threshold -> 2 grid tiles (megacore path on v7x) ----
    B2 = 1040
    x2 = jax.random.normal(k_x2, (B2, IN_FEATURES), dtype=jnp.float32)
    out2 = jax.block_until_ready(qrdqn_forward(x2, params_f32))
    assert out2.shape == (B2, N_ACTIONS, N_QUANTILES), out2.shape
    assert jnp.allclose(out2, ref_forward(x2), atol=1e-5, rtol=1e-5), "multi-tile mismatch"

    # ---- optional bf16 fc2 fast path (v6e/v7x MXU-native), relaxed tolerance ----
    params_bf16 = prepare_params(w1, b1, w2, b2, fc2_dtype=jnp.bfloat16)
    out_bf = jax.block_until_ready(qrdqn_forward(x, params_bf16))
    assert out_bf.shape == (B, N_ACTIONS, N_QUANTILES), out_bf.shape
    assert jnp.allclose(out_bf, ref, atol=1e-1, rtol=5e-2), "bf16 mismatch vs reference"

    print("KERNEL_OK")
</pallas_src>

<mosaic_0001>
module attributes {stable_mosaic.version = 11 : i64} {
  func.func @qrdqn_kernel(%arg0: i32, %arg1: memref<8x4xf32, #tpu.memory_space<vmem>>, %arg2: memref<8x128xf32, #tpu.memory_space<vmem>>, %arg3: memref<1x128xf32, #tpu.memory_space<vmem>>, %arg4: memref<128x128xf32, #tpu.memory_space<vmem>>, %arg5: memref<1x128xf32, #tpu.memory_space<vmem>>, %arg6: memref<8x128xf32, #tpu.memory_space<vmem>>) attributes {dimension_semantics = [#tpu.dimension_semantics<parallel>], iteration_bounds = array<i64: 1>, scalar_prefetch = 0 : i64, scratch_operands = 0 : i64, tpu.core_type = #tpu.core_type<tc>, window_params = [{transform_indices = @transform_0, window_bounds = array<i64: 8, 4>}, {pipeline_mode = #tpu.pipeline_mode<synchronous>, transform_indices = @transform_1, window_bounds = array<i64: 8, 128>}, {pipeline_mode = #tpu.pipeline_mode<synchronous>, transform_indices = @transform_2, window_bounds = array<i64: 1, 128>}, {pipeline_mode = #tpu.pipeline_mode<synchronous>, transform_indices = @transform_3, window_bounds = array<i64: 128, 128>}, {pipeline_mode = #tpu.pipeline_mode<synchronous>, transform_indices = @transform_4, window_bounds = array<i64: 1, 128>}, {transform_indices = @transform_5, window_bounds = array<i64: 8, 128>}]} {
    %c0 = arith.constant 0 : index
    %c0_0 = arith.constant 0 : index
    %0 = vector.load %arg1[%c0, %c0_0] : memref<8x4xf32, #tpu.memory_space<vmem>>, vector<8x4xf32>
    %c0_1 = arith.constant 0 : index
    %c0_2 = arith.constant 0 : index
    %1 = vector.load %arg2[%c0_1, %c0_2] : memref<8x128xf32, #tpu.memory_space<vmem>>, vector<8x128xf32>
    %c0_3 = arith.constant 0 : index
    %c0_4 = arith.constant 0 : index
    %2 = vector.load %arg3[%c0_3, %c0_4] : memref<1x128xf32, #tpu.memory_space<vmem>>, vector<1x128xf32>
    %3 = vector.shape_cast %2 : vector<1x128xf32> to vector<1x128xf32>
    %4 = vector.broadcast %3 : vector<1x128xf32> to vector<8x128xf32>
    %5 = vector.extract_strided_slice %0 {offsets = [0, 0], sizes = [8, 1], strides = [1, 1]} : vector<8x4xf32> to vector<8x1xf32>
    %6 = vector.extract_strided_slice %1 {offsets = [0, 0], sizes = [1, 128], strides = [1, 1]} : vector<8x128xf32> to vector<1x128xf32>
    %7 = vector.broadcast %5 : vector<8x1xf32> to vector<8x128xf32>
    %8 = vector.broadcast %6 : vector<1x128xf32> to vector<8x128xf32>
    %9 = arith.mulf %7, %8 : vector<8x128xf32>
    %10 = arith.addf %4, %9 : vector<8x128xf32>
    %11 = vector.extract_strided_slice %0 {offsets = [0, 1], sizes = [8, 1], strides = [1, 1]} : vector<8x4xf32> to vector<8x1xf32>
    %12 = vector.extract_strided_slice %1 {offsets = [1, 0], sizes = [1, 128], strides = [1, 1]} : vector<8x128xf32> to vector<1x128xf32>
    %13 = vector.broadcast %11 : vector<8x1xf32> to vector<8x128xf32>
    %14 = vector.broadcast %12 : vector<1x128xf32> to vector<8x128xf32>
    %15 = arith.mulf %13, %14 : vector<8x128xf32>
    %16 = arith.addf %10, %15 : vector<8x128xf32>
    %17 = vector.extract_strided_slice %0 {offsets = [0, 2], sizes = [8, 1], strides = [1, 1]} : vector<8x4xf32> to vector<8x1xf32>
    %18 = vector.extract_strided_slice %1 {offsets = [2, 0], sizes = [1, 128], strides = [1, 1]} : vector<8x128xf32> to vector<1x128xf32>
    %19 = vector.broadcast %17 : vector<8x1xf32> to vector<8x128xf32>
    %20 = vector.broadcast %18 : vector<1x128xf32> to vector<8x128xf32>
    %21 = arith.mulf %19, %20 : vector<8x128xf32>
    %22 = arith.addf %16, %21 : vector<8x128xf32>
    %23 = vector.extract_strided_slice %0 {offsets = [0, 3], sizes = [8, 1], strides = [1, 1]} : vector<8x4xf32> to vector<8x1xf32>
    %24 = vector.extract_strided_slice %1 {offsets = [3, 0], sizes = [1, 128], strides = [1, 1]} : vector<8x128xf32> to vector<1x128xf32>
    %25 = vector.broadcast %23 : vector<8x1xf32> to vector<8x128xf32>
    %26 = vector.broadcast %24 : vector<1x128xf32> to vector<8x128xf32>
    %27 = arith.mulf %25, %26 : vector<8x128xf32>
    %28 = arith.addf %22, %27 : vector<8x128xf32>
    %cst = arith.constant 0.000000e+00 : f32
    %29 = vector.broadcast %cst : f32 to vector<8x128xf32>
    %30 = arith.maximumf %28, %29 : vector<8x128xf32>
    %c0_5 = arith.constant 0 : index
    %c0_6 = arith.constant 0 : index
    %31 = vector.load %arg4[%c0_5, %c0_6] : memref<128x128xf32, #tpu.memory_space<vmem>>, vector<128x128xf32>
    %cst_7 = arith.constant dense<0.000000e+00> : vector<8x128xf32>
    %32 = tpu.matmul %30, %31, %cst_7 {dimension_numbers = #tpu.dot_dimension_numbers<[1], [0], [0], [1], [0, 0, 1, 1], [], []>} : vector<8x128xf32>, vector<128x128xf32>, vector<8x128xf32> -> vector<8x128xf32>
    %c0_8 = arith.constant 0 : index
    %c0_9 = arith.constant 0 : index
    %33 = vector.load %arg5[%c0_8, %c0_9] : memref<1x128xf32, #tpu.memory_space<vmem>>, vector<1x128xf32>
    %34 = vector.broadcast %33 : vector<1x128xf32> to vector<8x128xf32>
    %35 = arith.addf %32, %34 : vector<8x128xf32>
    %c0_10 = arith.constant 0 : index
    %c0_11 = arith.constant 0 : index
    %36 = vector.load %arg6[%c0_10, %c0_11] : memref<8x128xf32, #tpu.memory_space<vmem>>, vector<8x128xf32>
    tpu.vector_store %arg6[%c0_10, %c0_11], %35 {strides = array<i32>} : memref<8x128xf32, #tpu.memory_space<vmem>>, vector<8x128xf32>,
    return
  }
  func.func @transform_0(%arg0: i32) -> (i32, i32) {
    %c0_i32 = arith.constant 0 : i32
    %c0_i32_0 = arith.constant 0 : i32
    return %arg0, %c0_i32 : i32, i32
  }
  func.func @transform_1(%arg0: i32) -> (i32, i32) {
    %c0_i32 = arith.constant 0 : i32
    %c0_i32_0 = arith.constant 0 : i32
    %c0_i32_1 = arith.constant 0 : i32
    return %c0_i32, %c0_i32_0 : i32, i32
  }
  func.func @transform_2(%arg0: i32) -> (i32, i32) {
    %c0_i32 = arith.constant 0 : i32
    %c0_i32_0 = arith.constant 0 : i32
    %c0_i32_1 = arith.constant 0 : i32
    return %c0_i32, %c0_i32_0 : i32, i32
  }
  func.func @transform_3(%arg0: i32) -> (i32, i32) {
    %c0_i32 = arith.constant 0 : i32
    %c0_i32_0 = arith.constant 0 : i32
    %c0_i32_1 = arith.constant 0 : i32
    return %c0_i32, %c0_i32_0 : i32, i32
  }
  func.func @transform_4(%arg0: i32) -> (i32, i32) {
    %c0_i32 = arith.constant 0 : i32
    %c0_i32_0 = arith.constant 0 : i32
    %c0_i32_1 = arith.constant 0 : i32
    return %c0_i32, %c0_i32_0 : i32, i32
  }
  func.func @transform_5(%arg0: i32) -> (i32, i32) {
    %c0_i32 = arith.constant 0 : i32
    %c0_i32_0 = arith.constant 0 : i32
    return %arg0, %c0_i32 : i32, i32
  }
}

</mosaic_0001>

<bundles_post_ra>
// kernel: tpu_custom_call.1
= control target key start
LH: loop header
LB: loop body
LE: loop exit
PB: predicated region body
PF: predicated region fallthrough
CT: control target
= control target key end

     0   :  { %10 = vsyncpa [#allocation3], 0  ;;  %s414_s0 = inlined_call_operand.vmem [shape: f32[8,4], index: 0, kind: input, shape index: {}]   ;;  %s415_s1 = inlined_call_operand.vmem [shape: f32[8,128], index: 1, kind: input, shape index: {}]   ;;  %s416_s2 = inlined_call_operand.vmem [shape: f32[1,128], index: 2, kind: input, shape index: {}]   ;;  %s417_s3 = inlined_call_operand.hbm [shape: f32[128,128], index: 3, kind: input, shape index: {}]   ;;  %s418_s4 = inlined_call_operand.vmem [shape: f32[1,128], index: 4, kind: input, shape index: {}]   ;;  %s419_s5 = inlined_call_operand.hbm [shape: f32[8,128], index: 5, kind: output, shape index: {}]  }
   0x1   :  { %11 = vsyncpa [#allocation4], 0  ;;  %s337_s18 = smov [#allocation2]   ;;  %s289_s22 = scalar_lea.hbm %s417_s3, 2048 }
   0x2   :  { %s23_s19 = sshll.u32 %s337_s18, 4  ;;  %p290_p0 = scmp.ne.s32.totalorder %s417_s3, %s289_s22  ;;  %s24_s19 = int_to_ptr.vmem [resolvable:$true] %s23_s19 }
   0x3   :  { %p293_p1 = scmp.lt.u32.totalorder %s289_s22, %s417_s3 }
   0x5   :  { %p295_p2 = pnand %p293_p1, %p290_p0 }
   0x7   :  { %298 = shalt.err (!%p295_p2)
}
   0x8   :  { %s299_s27 = scalar_lea.vmem %s24_s19, 2048  ;;  %p304_p4 = scmp.lt.s32.totalorder %s24_s19, %s24_s19 }
   0x9   :  { %p300_p3 = scmp.ne.s32.totalorder %s24_s19, %s299_s27  ;;  %p305_p5 = scmp.lt.s32.totalorder %s299_s27, %s299_s27 }
   0xb   :  { %p306_p6 = por %p305_p5, %p304_p4 }
   0xd   :  { %p307_p7 = pnand %p306_p6, %p300_p3 }
   0xf   :  { %310 = shalt.err (!%p307_p7)
}
  0x10   :  { %s338_s28 = smov 128   ;;  %s339_s29 = smov 8  }
  0x11   :  { %29 = dma.hbm_to_vmem [thread:$0]  %s417_s3, 2048, %s24_s19, [#allocation3], %s338_s28, %s338_s28, %s339_s29  }
  0x12   :  { %333 = dma.done.wait [#allocation3], 2048  }
  0x13   :  { %334 = vsyncadd [#allocation3], 4294965248  ;;  %v340_v0 = vmov 0   ;;  %v341_v1 = vmov 2   ;;  %v342_v2 = vmov 0.0|0.0   ;;  %v35_v3 = vld [vmem:[%s414_s0] sm:$0xff]  ;;  %v49_v31 = vlaneseq }
  0x14   :  { %284 = vset.pattern.permute.xlu0 %v340_v0  ;;  %286 = vset.pattern.permute.xlu1 %v341_v1  ;;  %v86_v4 = vld [vmem:[#allocation2] sm:$0xff]  ;;  %v87_v5 = vld [vmem:[#allocation2 + $0x8] sm:$0xff]  ;;  %v88_v7 = vld [vmem:[#allocation2 + $0x10] sm:$0xff]  ;;  %v343_v12 = vmov 1   ;;  %v344_v13 = vmov 3   ;;  %vm345_vm0 = vmmov 0  }
  0x15   :  { %249 = vmatprep.subr.bf16.mxu0 %v342_v2  ;;  %46 = vperm.xlu0 %284, %v35_v3   ;;  %v250_v6 = vpack.c.bf16 %v87_v5, %v86_v4  ;;  %v89_v8 = vld [vmem:[#allocation2 + $0x18] sm:$0xff]  ;;  %v90_v10 = vld [vmem:[#allocation2 + $0x20] sm:$0xff]  ;;  %v91_v11 = vld [vmem:[#allocation2 + $0x28] sm:$0xff]  ;;  %v346_v21 = vmov 0.0   ;;  %v50_v32 = vshrl.u32 %v49_v31, 7  ;;  %s347_s12 = smov [#allocation5]  }
  0x16   :  { %66 = vperm.xlu1 %286, %v35_v3   ;;  %v253_v9 = vpack.c.bf16 %v89_v8, %v88_v7  ;;  %v256_v14 = vpack.c.bf16 %v91_v11, %v90_v10  ;;  %v92_v15 = vld [vmem:[#allocation2 + $0x30] sm:$0xff]  ;;  %v93_v16 = vld [vmem:[#allocation2 + $0x38] sm:$0xff]  ;;  %v94_v18 = vld [vmem:[#allocation2 + $0x40] sm:$0xff]  ;;  %246 = vmatprep.mubr.msk.f32.mxu0 %vm345_vm0, %v346_v21  ;;  %s186_s13 = sshll.u32 %s347_s12, 4  ;;  %s187_s13 = int_to_ptr.vmem [resolvable:$true] %s186_s13 }
  0x17   :  { %251 = vmatpush3.bf16.msra.mxu0 %v250_v6  ;;  %v259_v17 = vpack.c.bf16 %v93_v16, %v92_v15  ;;  %v95_v19 = vld [vmem:[#allocation2 + $0x48] sm:$0xff]  ;;  %v96_v22 = vld [vmem:[#allocation2 + $0x50] sm:$0xff]  ;;  %v97_v23 = vld [vmem:[#allocation2 + $0x58] sm:$0xff]  ;;  %v51_v33 = vsub.s32 0, %v50_v32  ;;  %v61_v36 = vsub.s32 1, %v50_v32  ;;  %v71_v38 = vsub.s32 2, %v50_v32  ;;  %p316_p9 = scmp.lt.s32.totalorder %s187_s13, %s187_s13 }
  0x18   :  { %252 = vmatprep.subr.bf16.mxu0 %v342_v2  ;;  %v262_v20 = vpack.c.bf16 %v95_v19, %v94_v18  ;;  %v265_v24 = vpack.c.bf16 %v97_v23, %v96_v22  ;;  %v98_v25 = vld [vmem:[#allocation2 + $0x60] sm:$0xff]  ;;  %v99_v26 = vld [vmem:[#allocation2 + $0x68] sm:$0xff]  ;;  %v100_v28 = vld [vmem:[#allocation2 + $0x70] sm:$0xff]  ;;  %v81_v40 = vsub.s32 3, %v50_v32 }
  0x19   :  { %285 = vset.pattern.permute.xlu0 %v343_v12  ;;  %v268_v27 = vpack.c.bf16 %v99_v26, %v98_v25  ;;  %v101_v29 = vld [vmem:[#allocation2 + $0x78] sm:$0xff] }
  0x1a   :  { %287 = vset.pattern.permute.xlu1 %v344_v13  ;;  %56 = vperm.xlu0 %285, %v35_v3   ;;  %v271_v30 = vpack.c.bf16 %v101_v29, %v100_v28  ;;  %v36_v34 = vld [vmem:[%s415_s1] sm:$0xff] }
  0x1b   :  { %76 = vperm.xlu1 %287, %v35_v3   ;;  %254 = vmatpush3.bf16.msra.mxu0 %v253_v9  ;;  %v52_v35 = vrot.slane %v36_v34, %v51_v33  ;;  %v62_v42 = vrot.slane %v36_v34, %v61_v36  ;;  %v195_v43 = vld [vmem:[%s416_s2] ss:$0 sm:$0xff]  ;;  %v72_v44 = vrot.slane %v36_v34, %v71_v38  ;;  %s311_s2 = scalar_lea.vmem %s187_s13, 128 }
  0x1c   :  { %255 = vmatprep.subr.bf16.mxu0 %v342_v2  ;;  %v82_v45 = vrot.slane %v36_v34, %v81_v40  ;;  %v196_v56 = vld [vmem:[%s418_s4] ss:$0 sm:$0xff]  ;;  %p312_p8 = scmp.ne.s32.totalorder %s187_s13, %s311_s2  ;;  %p317_p10 = scmp.lt.s32.totalorder %s311_s2, %s311_s2 }
  0x1e   :  { %288 = vset.pattern.permute.xlu0 %v344_v13  ;;  %p318_p11 = por %p317_p10, %p316_p9 }
  0x1f   :  { %257 = vmatpush3.bf16.msra.mxu0 %v256_v14 }
  0x20   :  { %258 = vmatprep.subr.bf16.mxu0 %v342_v2  ;;  %p319_p12 = pnand %p318_p11, %p312_p8 }
  0x23   :  { %260 = vmatpush3.bf16.msra.mxu0 %v259_v17 }
  0x24   :  { %261 = vmatprep.subr.bf16.mxu0 %v342_v2 }
  0x27   :  { %263 = vmatpush3.bf16.msra.mxu0 %v262_v20 }
  0x28   :  { %264 = vmatprep.subr.bf16.mxu0 %v342_v2 }
  0x2b   :  { %266 = vmatpush3.bf16.msra.mxu0 %v265_v24 }
  0x2c   :  { %267 = vmatprep.subr.bf16.mxu0 %v342_v2 }
  0x2f   :  { %269 = vmatpush3.bf16.msra.mxu0 %v268_v27 }
  0x30   :  { %270 = vmatprep.subr.bf16.mxu0 %v342_v2 }
  0x33   :  { %272 = vmatpush3.bf16.msra.mxu0 %v271_v30 }
  0x94   :  { %v47_v37 = vpop.permute.xlu0 %46 }
  0x95   :  { %v67_v39 = vpop.permute.xlu1 %66  ;;  %v53_v41 = vmul.f32 %v52_v35, %v47_v37 }
  0x96   :  { %v73_v50 = vmul.f32 %v72_v44, %v67_v39 }
  0x97   :  { %v54_v48 = vadd.f32 %v195_v43, %v53_v41 }
  0x99   :  { %v57_v46 = vpop.permute.xlu0 %56 }
  0x9a   :  { %v77_v47 = vpop.permute.xlu1 %76  ;;  %v63_v49 = vmul.f32 %v62_v42, %v57_v46 }
  0x9b   :  { %v83_v52 = vmul.f32 %v82_v45, %v77_v47 }
  0x9c   :  { %v64_v51 = vadd.f32 %v63_v49, %v54_v48 }
  0x9e   :  { %v74_v53 = vadd.f32 %v73_v50, %v64_v51 }
  0xa0   :  { %v84_v54 = vadd.f32 %v83_v52, %v74_v53 }
  0xa2   :  { %v85_v55 = vmax.f32 %v84_v54, 0.0 }
  0xa4   :  { %247 = vmatmul.mubr.f32.vlgmr.msra.gmra.mrb[0].mxu0 %v85_v55 }
 0x177   :  { %v175_v57 = vpop.f32.mrb[0].mxu0 }
 0x178   :  { %v176_v58 = vadd.f32 %v196_v56, %v175_v57  ;;  %v248_v59 = vpop.f32.mrb[1].mxu0 }
 0x17a   :  { %179 = vst [vmem:[#allocation5] sm:$0xff] %v176_v58 }
 0x17b   :  { %322 = shalt.err (!%p319_p12)
}
 0x17c   :  { %s323_s16 = scalar_lea.hbm %s419_s5, 128 }
 0x17d   :  { %p324_p13 = scmp.ne.s32.totalorder %s419_s5, %s323_s16  ;;  %p327_p0 = scmp.lt.u32.totalorder %s323_s16, %s419_s5 }
 0x17f   :  { %p329_p1 = pnand %p327_p0, %p324_p13 }
 0x181   :  { %332 = shalt.err (!%p329_p1)
}
 0x182   :  { %189 = dma.vmem_to_hbm [thread:$0]  %s187_s13, 128, %s419_s5, [#allocation4]  }
 0x183   :  { %335 = dma.done.wait [#allocation4], 128  }
 0x184   :  { %336 = vsyncadd [#allocation4], 4294967168 }
 0x185   :  { %193 = vsyncpa [#allocation3], 1 }
 0x186   :  { %194 = vsyncpa [#allocation4], 1 }

</bundles_post_ra>
